<compile_context>
chip_gen: v5e
topology: v5e:2x2
jax: 0.10.0
libtpu: 0.0.40
codegen_flags: <defaults>
</compile_context>

<pallas_src>
import functools

import jax
import jax.numpy as jnp
from jax.experimental import pallas as pl
from jax.experimental.pallas import tpu as pltpu


def _sublane(dtype) -> int:
    # Sublane packing: 8 rows for 4-byte dtypes, 16 for 2-byte, 32 for 1-byte.
    return max(8, 32 // jnp.dtype(dtype).itemsize)


def _round_up(x: int, m: int) -> int:
    return (x + m - 1) // m * m


def _vmem_capacity_bytes() -> int:
    try:
        return int(pltpu.get_tpu_info().vmem_capacity_bytes)
    except Exception:
        return 64 * 1024 * 1024  # conservative (v7x per-TensorCore)


def _rmsnorm_kernel(x_ref, w_ref, o_ref, *, eps: float, inv_dim: float):
    # Matches the PyTorch reference exactly:
    #   (x.float() * rsqrt(mean(x.float()^2) + eps)).type_as(x) * weight
    # f32 accumulation, rsqrt on the EUP (free slot), static 1/dim (no divide),
    # cast back to the input dtype, then the elementwise-affine multiply.
    xf = x_ref[...].astype(jnp.float32)
    inv_rms = jax.lax.rsqrt(jnp.sum(xf * xf, axis=-1, keepdims=True) * inv_dim + eps)
    # TODO(synk): on v7x a bf16-native scale (x * inv_rms.astype(bf16) * w) would
    # cut VALU work ~30-40% at a tiny rounding cost; kept f32 to match the spec.
    o_ref[...] = (xf * inv_rms).astype(o_ref.dtype) * w_ref[...]


def rmsnorm(x: jax.Array, weight: jax.Array | None = None, *,
            eps: float = 1e-6) -> jax.Array:
    """RMSNorm over the last axis of x, with optional elementwise affine weight."""
    orig_shape = x.shape
    dim = orig_shape[-1]

    x2d = x.reshape(-1, dim)          # view only; no HBM copy
    rows = x2d.shape[0]
    itemsize = jnp.dtype(x.dtype).itemsize
    sub = _sublane(x.dtype)

    # Pre-cast the weight to x.dtype in the wrapper (no per-tile cast).  The
    # constant index_map below keeps it resident in VMEM across all steps.
    if weight is None:
        w2d = jnp.ones((1, dim), dtype=x.dtype)
    else:
        assert weight.shape == (dim,)
        w2d = weight.astype(x.dtype).reshape(1, dim)

    # ---- Tile sizing -------------------------------------------------------
    vmem_cap = _vmem_capacity_bytes()
    budget = vmem_cap // 2                       # headroom for compiler temps
    # Per tile-row VMEM: 2x double-buffered input + 2x double-buffered output
    # (native dtype) + ~3 f32 temporaries (x_f32, x*x, scaled product).
    vmem_per_row = dim * (4 * itemsize + 12)
    # HBM traffic per tile-row per grid step (read x + write out).
    hbm_per_row = dim * 2 * itemsize

    TARGET_STEP_BYTES = 16 << 20   # amortize ~0.35us/step pipeline overhead
    tile_rows = min(budget // vmem_per_row,
                    max(1, TARGET_STEP_BYTES // hbm_per_row))
    tile_rows = max(sub, (tile_rows // sub) * sub)

    rows_cap = _round_up(rows, sub)              # only used for sizing math
    tile_rows = min(tile_rows, rows_cap)

    # Keep >= 4 grid steps (>= 2 per TensorCore on v7x megacore) when the data
    # is big enough, so 'parallel' sharding and double-buffering stay useful.
    MIN_STEPS = 4
    if pl.cdiv(rows_cap, tile_rows) < MIN_STEPS and rows_cap >= MIN_STEPS * sub:
        tile_rows = max(sub, ((rows_cap // MIN_STEPS) // sub) * sub)

    grid = (pl.cdiv(rows, tile_rows),)           # last block may overhang

    # Explicit scoped-VMEM limit (v5e default is only 16 MiB) with generous
    # headroom for compiler scratch; capped below physical capacity.
    needed = tile_rows * vmem_per_row + 2 * dim * itemsize
    vmem_limit = int(min(vmem_cap * 9 // 10, max(needed + (8 << 20), 32 << 20)))

    out2d = pl.pallas_call(
        functools.partial(_rmsnorm_kernel, eps=eps, inv_dim=1.0 / dim),
        out_shape=jax.ShapeDtypeStruct((rows, dim), x.dtype),
        grid_spec=pltpu.PrefetchScalarGridSpec(
            num_scalar_prefetch=0,
            grid=grid,
            in_specs=[
                pl.BlockSpec((tile_rows, dim), lambda i: (i, 0)),  # x tile
                pl.BlockSpec((1, dim), lambda i: (0, 0)),          # resident weight
            ],
            out_specs=pl.BlockSpec((tile_rows, dim), lambda i: (i, 0)),
        ),
        compiler_params=pltpu.CompilerParams(
            dimension_semantics=("parallel",),   # shards row grid across TCs on v7x
            vmem_limit_bytes=vmem_limit,
        ),
    )(x2d, w2d)

    return out2d.reshape(orig_shape)


def rmsnorm_reference(x, weight, eps=1e-6):
    xf = x.astype(jnp.float32)
    out = xf * jax.lax.rsqrt(jnp.mean(xf * xf, axis=-1, keepdims=True) + eps)
    out = out.astype(x.dtype)
    if weight is not None:
        out = out * weight.astype(x.dtype)
    return out


if __name__ == "__main__":
    key = jax.random.PRNGKey(0)

    # Primary test: small, aligned shapes, f32 (matches nn.Parameter(torch.ones(dim))).
    B, S, D = 2, 8, 128
    x = jax.random.normal(key, (B, S, D), dtype=jnp.float32)
    weight = jnp.ones((D,), dtype=jnp.float32)

    out = rmsnorm(x, weight, eps=1e-6)
    out = jax.block_until_ready(out)
    ref = rmsnorm_reference(x, weight, eps=1e-6)
    assert out.shape == x.shape and out.dtype == x.dtype
    assert jnp.allclose(out, ref, atol=1e-5, rtol=1e-5)

    # Secondary test: bf16, ragged rows (15) and non-multiple-of-128 hidden dim
    # (96) -- exercises the overhanging last block and the full-dim lane block.
    k2 = jax.random.PRNGKey(1)
    x2 = jax.random.normal(k2, (3, 5, 96), dtype=jnp.bfloat16)
    w2 = (1.0 + 0.01 * jnp.arange(96, dtype=jnp.float32))
    out2 = jax.block_until_ready(rmsnorm(x2, w2, eps=1e-6))
    ref2 = rmsnorm_reference(x2, w2, eps=1e-6)
    assert out2.shape == x2.shape and out2.dtype == x2.dtype
    assert jnp.allclose(out2.astype(jnp.float32), ref2.astype(jnp.float32),
                        atol=2e-2, rtol=2e-2)

    # Third test: no elementwise affine (weight=None), odd leading dims.
    k3 = jax.random.PRNGKey(2)
    x3 = jax.random.normal(k3, (7, 3, 128), dtype=jnp.float32)
    out3 = jax.block_until_ready(rmsnorm(x3, None, eps=1e-6))
    ref3 = rmsnorm_reference(x3, None, eps=1e-6)
    assert jnp.allclose(out3, ref3, atol=1e-5, rtol=1e-5)

    print("KERNEL_OK")
</pallas_src>

<mosaic_0001>
module attributes {stable_mosaic.version = 11 : i64} {
  func.func @_rmsnorm_kernel(%arg0: i32, %arg1: memref<16x128xf32, #tpu.memory_space<vmem>>, %arg2: memref<1x128xf32, #tpu.memory_space<vmem>>, %arg3: memref<16x128xf32, #tpu.memory_space<vmem>>) attributes {dimension_semantics = [#tpu.dimension_semantics<parallel>], iteration_bounds = array<i64: 1>, scalar_prefetch = 0 : i64, scratch_operands = 0 : i64, tpu.core_type = #tpu.core_type<tc>, window_params = [{transform_indices = @transform_0, window_bounds = array<i64: 16, 128>}, {pipeline_mode = #tpu.pipeline_mode<synchronous>, transform_indices = @transform_1, window_bounds = array<i64: 1, 128>}, {transform_indices = @transform_2, window_bounds = array<i64: 16, 128>}]} {
    %c0 = arith.constant 0 : index
    %c0_0 = arith.constant 0 : index
    %0 = vector.load %arg1[%c0, %c0_0] : memref<16x128xf32, #tpu.memory_space<vmem>>, vector<16x128xf32>
    %1 = arith.mulf %0, %0 : vector<16x128xf32>
    %cst = arith.constant dense<0.000000e+00> : vector<16xf32>
    %2 = vector.multi_reduction <add>, %1, %cst [1] : vector<16x128xf32> to vector<16xf32>
    %3 = vector.shape_cast %2 : vector<16xf32> to vector<16x1xf32>
    %cst_1 = arith.constant 7.812500e-03 : f32
    %4 = vector.broadcast %cst_1 : f32 to vector<16x1xf32>
    %5 = arith.mulf %3, %4 : vector<16x1xf32>
    %cst_2 = arith.constant 9.99999997E-7 : f32
    %6 = vector.broadcast %cst_2 : f32 to vector<16x1xf32>
    %7 = arith.addf %5, %6 : vector<16x1xf32>
    %8 = math.rsqrt %7 : vector<16x1xf32>
    %9 = vector.broadcast %8 : vector<16x1xf32> to vector<16x128xf32>
    %10 = arith.mulf %0, %9 : vector<16x128xf32>
    %c0_3 = arith.constant 0 : index
    %c0_4 = arith.constant 0 : index
    %11 = vector.load %arg2[%c0_3, %c0_4] : memref<1x128xf32, #tpu.memory_space<vmem>>, vector<1x128xf32>
    %12 = vector.broadcast %11 : vector<1x128xf32> to vector<16x128xf32>
    %13 = arith.mulf %10, %12 : vector<16x128xf32>
    %c0_5 = arith.constant 0 : index
    %c0_6 = arith.constant 0 : index
    %14 = vector.load %arg3[%c0_5, %c0_6] : memref<16x128xf32, #tpu.memory_space<vmem>>, vector<16x128xf32>
    tpu.vector_store %arg3[%c0_5, %c0_6], %13 {strides = array<i32>} : memref<16x128xf32, #tpu.memory_space<vmem>>, vector<16x128xf32>,
    return
  }
  func.func @transform_0(%arg0: i32) -> (i32, i32) {
    %c0_i32 = arith.constant 0 : i32
    %c0_i32_0 = arith.constant 0 : i32
    return %arg0, %c0_i32 : i32, i32
  }
  func.func @transform_1(%arg0: i32) -> (i32, i32) {
    %c0_i32 = arith.constant 0 : i32
    %c0_i32_0 = arith.constant 0 : i32
    %c0_i32_1 = arith.constant 0 : i32
    return %c0_i32, %c0_i32_0 : i32, i32
  }
  func.func @transform_2(%arg0: i32) -> (i32, i32) {
    %c0_i32 = arith.constant 0 : i32
    %c0_i32_0 = arith.constant 0 : i32
    return %arg0, %c0_i32 : i32, i32
  }
}

</mosaic_0001>

<bundles_post_ra>
// kernel: tpu_custom_call.1
= control target key start
LH: loop header
LB: loop body
LE: loop exit
PB: predicated region body
PF: predicated region fallthrough
CT: control target
= control target key end

     0   :  { %7 = vsyncpa [#allocation3], 0  ;;  %s227_s0 = inlined_call_operand.hbm [shape: f32[16,128], index: 0, kind: input, shape index: {}]   ;;  %s228_s1 = inlined_call_operand.hbm [shape: f32[1,128], index: 1, kind: input, shape index: {}]   ;;  %s229_s2 = inlined_call_operand.hbm [shape: f32[16,128], index: 2, kind: output, shape index: {}]  }
   0x1   :  { %8 = vsyncpa [#allocation6], 0 }
   0x2   :  { %9 = vsyncpa [#allocation4], 0  ;;  %s14_s11 = sshll.u32 %s227_s0, 4  ;;  %s192_s12 = smov [#allocation2]   ;;  %s15_s11 = int_to_ptr.hbm [resolvable:$true] %s14_s11 }
   0x3   :  { %s16_s13 = sshll.u32 %s192_s12, 4  ;;  %s28_s16 = sshll.u32 %s228_s1, 4  ;;  %s17_s13 = int_to_ptr.vmem [resolvable:$true] %s16_s13  ;;  %s29_s16 = int_to_ptr.hbm [resolvable:$true] %s28_s16 }
   0x4   :  { %s193_s17 = smov 128   ;;  %s194_s18 = smov 8  }
   0x5   :  { %22 = dma.hbm_to_vmem [thread:$0]  %s15_s11, 256, %s17_s13, [#allocation3], %s193_s17, %s193_s17, %s194_s18  }
   0x6   :  { %s195_s19 = smov [#allocation5]  }
   0x7   :  { %s30_s20 = sshll.u32 %s195_s19, 4  ;;  %s31_s20 = int_to_ptr.vmem [resolvable:$true] %s30_s20 }
   0x8   :  { %33 = dma.hbm_to_vmem [thread:$0]  %s29_s16, 16, %s31_s20, [#allocation6]  }
   0x9   :  { %186 = dma.done.wait [#allocation3], 256  }
   0xa   :  { %187 = vsyncadd [#allocation3], 4294967040 }
   0xb   :  { %188 = dma.done.wait [#allocation6], 16  }
   0xc   :  { %189 = vsyncadd [#allocation6], 4294967280  ;;  %v42_v0 = vld [vmem:[#allocation2] sm:$0xff]  ;;  %v43_v2 = vld [vmem:[#allocation2 + $0x8] sm:$0xff]  ;;  %s196_s0 = smov [#allocation7]   ;;  %s90_s23 = sshll.u32 %s229_s2, 4  ;;  %s91_s23 = int_to_ptr.hbm [resolvable:$true] %s90_s23 }
   0xd   :  { %v44_v1 = vmul.f32 %v42_v0, %v42_v0  ;;  %v45_v3 = vmul.f32 %v43_v2, %v43_v2  ;;  %v109_v18 = vld [vmem:[#allocation5] ss:$0 sm:$0xff]  ;;  %s88_s1 = sshll.u32 %s196_s0, 4  ;;  %s89_s1 = int_to_ptr.vmem [resolvable:$true] %s88_s1 }
   0xf   :  { %46 = vadd.xlane.f32.xlu0 %v44_v1 }
  0x17   :  { %48 = vadd.xlane.f32.xlu0 %v45_v3 }
  0x82   :  { %v47_v4 = vpop.xlane.xlu0 %46 }
  0x83   :  { %v50_v5 = vmul.f32 0.0078125, %v47_v4 }
  0x85   :  { %v52_v6 = vadd.f32 1e-06, %v50_v5 }
  0x87   :  { %110 = vrsqrt.f32 %v52_v6  ;;  %vm60_vm1 = vweird.f32 %v52_v6 }
  0x8a   :  { %v49_v7 = vpop.xlane.xlu0 %48 }
  0x8b   :  { %v51_v8 = vmul.f32 0.0078125, %v49_v7 }
  0x8d   :  { %v111_v9 = vpop.eup %110  ;;  %v53_v10 = vadd.f32 1e-06, %v51_v8 }
  0x8e   :  { %v55_v11 = vmul.f32 %v111_v9, %v52_v6  ;;  %vm61_vm0 = vweird.f32 %v111_v9 }
  0x8f   :  { %112 = vrsqrt.f32 %v53_v10  ;;  %vm62_vm2 = vmor %vm60_vm1, %vm61_vm0  ;;  %vm70_vm4 = vweird.f32 %v53_v10 }
  0x90   :  { %v56_v12 = vmul.f32 %v111_v9, %v55_v11 }
  0x92   :  { %v57_v13 = vmul.f32 0.5, %v56_v12 }
  0x94   :  { %v58_v14 = vsub.f32 1.5, %v57_v13 }
  0x95   :  { %v113_v15 = vpop.eup %112 }
  0x96   :  { %v59_v16 = vmul.f32 %v111_v9, %v58_v14  ;;  %v65_v17 = vmul.f32 %v113_v15, %v53_v10  ;;  %vm71_vm3 = vweird.f32 %v113_v15 }
  0x97   :  { %vm72_vm5 = vmor %vm70_vm4, %vm71_vm3 }
  0x98   :  { %v63_v19 = vsel %vm62_vm2, %v111_v9, %v59_v16  ;;  %v66_v20 = vmul.f32 %v113_v15, %v65_v17 }
  0x99   :  { %v74_v21 = vmul.f32 %v63_v19, %v42_v0 }
  0x9a   :  { %v67_v22 = vmul.f32 0.5, %v66_v20 }
  0x9b   :  { %v80_v23 = vmul.f32 %v109_v18, %v74_v21 }
  0x9c   :  { %v68_v24 = vsub.f32 1.5, %v67_v22 }
  0x9d   :  { %82 = vst [vmem:[#allocation7] sm:$0xff] %v80_v23 }
  0x9e   :  { %v69_v25 = vmul.f32 %v113_v15, %v68_v24 }
  0xa0   :  { %v73_v26 = vsel %vm72_vm5, %v113_v15, %v69_v25 }
  0xa1   :  { %v75_v27 = vmul.f32 %v73_v26, %v43_v2 }
  0xa3   :  { %v81_v28 = vmul.f32 %v109_v18, %v75_v27 }
  0xa5   :  { %83 = vst [vmem:[#allocation7 + $0x8] sm:$0xff] %v81_v28 }
  0xa6   :  { %96 = dma.vmem_to_hbm [thread:$0]  %s89_s1, 256, %s91_s23, [#allocation4], %s193_s17, %s193_s17, %s194_s18  }
  0xa7   :  { %190 = dma.done.wait [#allocation4], 256  }
  0xa8   :  { %191 = vsyncadd [#allocation4], 4294967040 }
  0xa9   :  { %101 = vsyncpa [#allocation3], 1 }
  0xaa   :  { %102 = vsyncpa [#allocation6], 1 }
  0xab   :  { %103 = vsyncpa [#allocation4], 1 }

</bundles_post_ra>
